<compile_context>
chip_gen: v7x
topology: tpu7x:2x2x1
jax: 0.10.0
libtpu: 0.0.40
codegen_flags: <defaults>
</compile_context>

<pallas_src>
import functools

import jax
import jax.numpy as jnp
from jax.experimental import pallas as pl
from jax.experimental.pallas import tpu as pltpu


def _soft_kernel(idx_ref, kv_ref, w_ref, out_ref, gbuf, *, p2, topk, tj):
    """One grid step = (batch i, window-group j): gather tj*topk rows from the
    VMEM-resident kv slab, then one block-wide f32 scale + lane-dense store."""
    i = pl.program_id(0)
    j = pl.program_id(1)
    rows = tj * topk
    base = (i * p2 + j * tj) * topk

    # Hoist every scalar SMEM index read up front (scalar slots, no re-reads).
    idxs = [idx_ref[base + k] for k in range(rows)]

    # Gather: dynamic sublane-indexed reads from the per-batch VMEM slab.
    for k in range(rows):
        gbuf[k, :] = kv_ref[idxs[k], :]

    # Single block-wide multiply in f32 + one unmasked lane-dense store.
    out_ref[...] = (gbuf[...].astype(jnp.float32) * w_ref[...]).astype(out_ref.dtype)


def _none_kernel(idx_ref, kv_ref, out_ref, *, p2, topk, tj):
    """Pure gather-copy out of the VMEM-resident kv slab (no weighting)."""
    i = pl.program_id(0)
    j = pl.program_id(1)
    rows = tj * topk
    base = (i * p2 + j * tj) * topk

    idxs = [idx_ref[base + k] for k in range(rows)]
    for k in range(rows):
        out_ref[k, :] = kv_ref[idxs[k], :]


def _pick_tj(p2, topk, L, out_itemsize, max_rows=64, max_bytes=1 << 20):
    """Largest number of fused query windows per grid step such that:
       * tj divides p2,
       * the (tj*topk, L) block shape is legal (tj*topk % 8 == 0, or tj == p2),
       * the output block stays <= ~1 MiB and <= max_rows gathered rows."""
    best = None
    for tj in range(1, p2 + 1):
        if p2 % tj:
            continue
        rows = tj * topk
        if tj != p2 and rows % 8:
            continue
        if rows <= max_rows and rows * L * out_itemsize <= max_bytes:
            best = tj
    if best is None:
        best = p2  # whole-p2 block is always shape-legal (equals full dims)
    return best


def kv_gather(r_idx, r_weight, kv, mul_weight="none"):
    """Pallas implementation of KVGather.forward.

    r_idx:    (n, p2, topk) integer
    r_weight: (n, p2, topk) float
    kv:       (n, p2, w2, c_kv)
    returns:  (n, p2, topk, w2, c_kv)
    """
    assert mul_weight in ("none", "soft", "hard")
    if mul_weight == "hard":
        # TODO(synk): differentiable hard routing is NotImplemented in the reference too.
        raise NotImplementedError("differentiable hard routing TBA")

    n, p2, w2, c_kv = kv.shape
    topk = r_idx.shape[-1]
    L = w2 * c_kv

    # Lane-dense view: one gathered "row" is a contiguous L-element slab.
    kv_rows = kv.reshape(n, p2, L)
    # Clamp so a bad index can never read OOB. NOTE: torch.gather would raise on
    # out-of-range indices; for valid inputs this clamp is a no-op.
    idx_flat = jnp.clip(r_idx.astype(jnp.int32), 0, p2 - 1).reshape(-1)

    kv_item = jnp.dtype(kv.dtype).itemsize
    if mul_weight == "soft":
        out_dtype = jnp.result_type(kv.dtype, r_weight.dtype)
    else:
        out_dtype = kv.dtype
    out_item = jnp.dtype(out_dtype).itemsize

    tj = _pick_tj(p2, topk, L, out_item)
    rows = tj * topk
    grid = (n, p2 // tj)

    # kv slab is re-fetched only when the batch index changes.
    kv_spec = pl.BlockSpec((pl.Squeezed(), p2, L), lambda i, j, idx: (i, 0, 0))
    out_spec = pl.BlockSpec((pl.Squeezed(), rows, L), lambda i, j, idx: (i, j, 0))

    # VMEM budget: double-buffered kv/out (+weights) blocks + gather scratch + slack.
    need = 2 * p2 * L * kv_item + 2 * rows * L * out_item + 2 * rows * 4
    need += rows * L * kv_item + (2 << 20)
    vmem_limit = int(min(max(need, 32 << 20), 64 << 20))
    cparams = pltpu.CompilerParams(
        dimension_semantics=("parallel", "parallel"),
        vmem_limit_bytes=vmem_limit,
    )

    if mul_weight == "soft":
        w_arr = r_weight.astype(jnp.float32).reshape(n, p2 * topk, 1)
        w_spec = pl.BlockSpec((pl.Squeezed(), rows, 1), lambda i, j, idx: (i, j, 0))
        cost = pl.CostEstimate(
            flops=n * p2 * topk * L,
            transcendentals=0,
            bytes_accessed=(n * p2 * L * kv_item            # kv read once per batch
                            + n * p2 * topk * (4 + 4)       # idx + weights
                            + n * p2 * topk * L * out_item),
        )
        grid_spec = pltpu.PrefetchScalarGridSpec(
            num_scalar_prefetch=1,                           # only r_idx in SMEM
            grid=grid,
            in_specs=[kv_spec, w_spec],
            out_specs=out_spec,
            scratch_shapes=[pltpu.VMEM((rows, L), kv.dtype)],
        )
        out_flat = pl.pallas_call(
            functools.partial(_soft_kernel, p2=p2, topk=topk, tj=tj),
            out_shape=jax.ShapeDtypeStruct((n, p2 * topk, L), out_dtype),
            grid_spec=grid_spec,
            compiler_params=cparams,
            cost_estimate=cost,
        )(idx_flat, kv_rows, w_arr)
    else:  # "none": gather-copy only
        cost = pl.CostEstimate(
            flops=0,
            transcendentals=0,
            bytes_accessed=(n * p2 * L * kv_item
                            + n * p2 * topk * 4
                            + n * p2 * topk * L * out_item),
        )
        grid_spec = pltpu.PrefetchScalarGridSpec(
            num_scalar_prefetch=1,
            grid=grid,
            in_specs=[kv_spec],
            out_specs=out_spec,
        )
        out_flat = pl.pallas_call(
            functools.partial(_none_kernel, p2=p2, topk=topk, tj=tj),
            out_shape=jax.ShapeDtypeStruct((n, p2 * topk, L), out_dtype),
            grid_spec=grid_spec,
            compiler_params=cparams,
            cost_estimate=cost,
        )(idx_flat, kv_rows)

    return out_flat.reshape(n, p2, topk, w2, c_kv)


def kv_gather_ref(r_idx, r_weight, kv, mul_weight="none"):
    """Pure-JAX reference mirroring the PyTorch semantics."""
    n, p2, w2, c_kv = kv.shape
    gathered = jnp.take_along_axis(
        jnp.broadcast_to(kv[:, None], (n, p2, p2, w2, c_kv)),
        r_idx[:, :, :, None, None].astype(jnp.int32),
        axis=2,
    )  # (n, p2, topk, w2, c_kv)
    if mul_weight == "soft":
        gathered = r_weight[:, :, :, None, None] * gathered
    return gathered


if __name__ == "__main__":
    key = jax.random.PRNGKey(0)
    k_idx, k_w, k_kv = jax.random.split(key, 3)

    n, p2, w2, c_kv, topk = 2, 8, 16, 32, 4

    r_idx = jax.random.randint(k_idx, (n, p2, topk), 0, p2, dtype=jnp.int32)
    r_weight = jax.random.uniform(k_w, (n, p2, topk), dtype=jnp.float32)
    kv = jax.random.normal(k_kv, (n, p2, w2, c_kv), dtype=jnp.float32)

    ok = True
    for mode in ("none", "soft"):
        out = jax.block_until_ready(kv_gather(r_idx, r_weight, kv, mul_weight=mode))
        ref = kv_gather_ref(r_idx, r_weight, kv, mul_weight=mode)
        if out.shape != ref.shape or not jnp.allclose(out, ref, atol=1e-5, rtol=1e-5):
            ok = False

    # Mixed-dtype check: bf16 kv x f32 weights must promote to f32 like the reference.
    kv_bf16 = kv.astype(jnp.bfloat16)
    out_mixed = jax.block_until_ready(kv_gather(r_idx, r_weight, kv_bf16, mul_weight="soft"))
    ref_mixed = kv_gather_ref(r_idx, r_weight, kv_bf16, mul_weight="soft")
    if out_mixed.dtype != ref_mixed.dtype or not jnp.allclose(
        out_mixed, ref_mixed, atol=1e-2, rtol=1e-2
    ):
        ok = False

    if ok:
        print("KERNEL_OK")
</pallas_src>

<mosaic_0001>
module attributes {stable_mosaic.version = 11 : i64} {
  func.func @_none_kernel(%arg0: i32, %arg1: i32, %arg2: memref<64xi32, #tpu.memory_space<smem>>, %arg3: memref<1x8x512xf32, #tpu.memory_space<vmem>>, %arg4: memref<1x32x512xf32, #tpu.memory_space<vmem>>) attributes {dimension_semantics = [#tpu.dimension_semantics<parallel>, #tpu.dimension_semantics<parallel>], iteration_bounds = array<i64: 2, 1>, scalar_prefetch = 1 : i64, scratch_operands = 0 : i64, tpu.core_type = #tpu.core_type<tc>, window_params = [{transform_indices = @transform_0, window_bounds = array<i64: 1, 8, 512>}, {transform_indices = @transform_1, window_bounds = array<i64: 1, 32, 512>}]} {
    %c8_i32 = arith.constant 8 : i32
    %0 = arith.muli %arg0, %c8_i32 : i32
    %c8_i32_0 = arith.constant 8 : i32
    %1 = arith.muli %arg1, %c8_i32_0 : i32
    %2 = arith.addi %0, %1 : i32
    %c4_i32 = arith.constant 4 : i32
    %3 = arith.muli %2, %c4_i32 : i32
    %c0_i32 = arith.constant 0 : i32
    %4 = arith.addi %3, %c0_i32 : i32
    %5 = arith.index_cast %4 : i32 to index
    %6 = memref.load %arg2[%5] : memref<64xi32, #tpu.memory_space<smem>>
    %c1_i32 = arith.constant 1 : i32
    %7 = arith.addi %3, %c1_i32 : i32
    %8 = arith.index_cast %7 : i32 to index
    %9 = memref.load %arg2[%8] : memref<64xi32, #tpu.memory_space<smem>>
    %c2_i32 = arith.constant 2 : i32
    %10 = arith.addi %3, %c2_i32 : i32
    %11 = arith.index_cast %10 : i32 to index
    %12 = memref.load %arg2[%11] : memref<64xi32, #tpu.memory_space<smem>>
    %c3_i32 = arith.constant 3 : i32
    %13 = arith.addi %3, %c3_i32 : i32
    %14 = arith.index_cast %13 : i32 to index
    %15 = memref.load %arg2[%14] : memref<64xi32, #tpu.memory_space<smem>>
    %c4_i32_1 = arith.constant 4 : i32
    %16 = arith.addi %3, %c4_i32_1 : i32
    %17 = arith.index_cast %16 : i32 to index
    %18 = memref.load %arg2[%17] : memref<64xi32, #tpu.memory_space<smem>>
    %c5_i32 = arith.constant 5 : i32
    %19 = arith.addi %3, %c5_i32 : i32
    %20 = arith.index_cast %19 : i32 to index
    %21 = memref.load %arg2[%20] : memref<64xi32, #tpu.memory_space<smem>>
    %c6_i32 = arith.constant 6 : i32
    %22 = arith.addi %3, %c6_i32 : i32
    %23 = arith.index_cast %22 : i32 to index
    %24 = memref.load %arg2[%23] : memref<64xi32, #tpu.memory_space<smem>>
    %c7_i32 = arith.constant 7 : i32
    %25 = arith.addi %3, %c7_i32 : i32
    %26 = arith.index_cast %25 : i32 to index
    %27 = memref.load %arg2[%26] : memref<64xi32, #tpu.memory_space<smem>>
    %c8_i32_2 = arith.constant 8 : i32
    %28 = arith.addi %3, %c8_i32_2 : i32
    %29 = arith.index_cast %28 : i32 to index
    %30 = memref.load %arg2[%29] : memref<64xi32, #tpu.memory_space<smem>>
    %c9_i32 = arith.constant 9 : i32
    %31 = arith.addi %3, %c9_i32 : i32
    %32 = arith.index_cast %31 : i32 to index
    %33 = memref.load %arg2[%32] : memref<64xi32, #tpu.memory_space<smem>>
    %c10_i32 = arith.constant 10 : i32
    %34 = arith.addi %3, %c10_i32 : i32
    %35 = arith.index_cast %34 : i32 to index
    %36 = memref.load %arg2[%35] : memref<64xi32, #tpu.memory_space<smem>>
    %c11_i32 = arith.constant 11 : i32
    %37 = arith.addi %3, %c11_i32 : i32
    %38 = arith.index_cast %37 : i32 to index
    %39 = memref.load %arg2[%38] : memref<64xi32, #tpu.memory_space<smem>>
    %c12_i32 = arith.constant 12 : i32
    %40 = arith.addi %3, %c12_i32 : i32
    %41 = arith.index_cast %40 : i32 to index
    %42 = memref.load %arg2[%41] : memref<64xi32, #tpu.memory_space<smem>>
    %c13_i32 = arith.constant 13 : i32
    %43 = arith.addi %3, %c13_i32 : i32
    %44 = arith.index_cast %43 : i32 to index
    %45 = memref.load %arg2[%44] : memref<64xi32, #tpu.memory_space<smem>>
    %c14_i32 = arith.constant 14 : i32
    %46 = arith.addi %3, %c14_i32 : i32
    %47 = arith.index_cast %46 : i32 to index
    %48 = memref.load %arg2[%47] : memref<64xi32, #tpu.memory_space<smem>>
    %c15_i32 = arith.constant 15 : i32
    %49 = arith.addi %3, %c15_i32 : i32
    %50 = arith.index_cast %49 : i32 to index
    %51 = memref.load %arg2[%50] : memref<64xi32, #tpu.memory_space<smem>>
    %c16_i32 = arith.constant 16 : i32
    %52 = arith.addi %3, %c16_i32 : i32
    %53 = arith.index_cast %52 : i32 to index
    %54 = memref.load %arg2[%53] : memref<64xi32, #tpu.memory_space<smem>>
    %c17_i32 = arith.constant 17 : i32
    %55 = arith.addi %3, %c17_i32 : i32
    %56 = arith.index_cast %55 : i32 to index
    %57 = memref.load %arg2[%56] : memref<64xi32, #tpu.memory_space<smem>>
    %c18_i32 = arith.constant 18 : i32
    %58 = arith.addi %3, %c18_i32 : i32
    %59 = arith.index_cast %58 : i32 to index
    %60 = memref.load %arg2[%59] : memref<64xi32, #tpu.memory_space<smem>>
    %c19_i32 = arith.constant 19 : i32
    %61 = arith.addi %3, %c19_i32 : i32
    %62 = arith.index_cast %61 : i32 to index
    %63 = memref.load %arg2[%62] : memref<64xi32, #tpu.memory_space<smem>>
    %c20_i32 = arith.constant 20 : i32
    %64 = arith.addi %3, %c20_i32 : i32
    %65 = arith.index_cast %64 : i32 to index
    %66 = memref.load %arg2[%65] : memref<64xi32, #tpu.memory_space<smem>>
    %c21_i32 = arith.constant 21 : i32
    %67 = arith.addi %3, %c21_i32 : i32
    %68 = arith.index_cast %67 : i32 to index
    %69 = memref.load %arg2[%68] : memref<64xi32, #tpu.memory_space<smem>>
    %c22_i32 = arith.constant 22 : i32
    %70 = arith.addi %3, %c22_i32 : i32
    %71 = arith.index_cast %70 : i32 to index
    %72 = memref.load %arg2[%71] : memref<64xi32, #tpu.memory_space<smem>>
    %c23_i32 = arith.constant 23 : i32
    %73 = arith.addi %3, %c23_i32 : i32
    %74 = arith.index_cast %73 : i32 to index
    %75 = memref.load %arg2[%74] : memref<64xi32, #tpu.memory_space<smem>>
    %c24_i32 = arith.constant 24 : i32
    %76 = arith.addi %3, %c24_i32 : i32
    %77 = arith.index_cast %76 : i32 to index
    %78 = memref.load %arg2[%77] : memref<64xi32, #tpu.memory_space<smem>>
    %c25_i32 = arith.constant 25 : i32
    %79 = arith.addi %3, %c25_i32 : i32
    %80 = arith.index_cast %79 : i32 to index
    %81 = memref.load %arg2[%80] : memref<64xi32, #tpu.memory_space<smem>>
    %c26_i32 = arith.constant 26 : i32
    %82 = arith.addi %3, %c26_i32 : i32
    %83 = arith.index_cast %82 : i32 to index
    %84 = memref.load %arg2[%83] : memref<64xi32, #tpu.memory_space<smem>>
    %c27_i32 = arith.constant 27 : i32
    %85 = arith.addi %3, %c27_i32 : i32
    %86 = arith.index_cast %85 : i32 to index
    %87 = memref.load %arg2[%86] : memref<64xi32, #tpu.memory_space<smem>>
    %c28_i32 = arith.constant 28 : i32
    %88 = arith.addi %3, %c28_i32 : i32
    %89 = arith.index_cast %88 : i32 to index
    %90 = memref.load %arg2[%89] : memref<64xi32, #tpu.memory_space<smem>>
    %c29_i32 = arith.constant 29 : i32
    %91 = arith.addi %3, %c29_i32 : i32
    %92 = arith.index_cast %91 : i32 to index
    %93 = memref.load %arg2[%92] : memref<64xi32, #tpu.memory_space<smem>>
    %c30_i32 = arith.constant 30 : i32
    %94 = arith.addi %3, %c30_i32 : i32
    %95 = arith.index_cast %94 : i32 to index
    %96 = memref.load %arg2[%95] : memref<64xi32, #tpu.memory_space<smem>>
    %c31_i32 = arith.constant 31 : i32
    %97 = arith.addi %3, %c31_i32 : i32
    %98 = arith.index_cast %97 : i32 to index
    %99 = memref.load %arg2[%98] : memref<64xi32, #tpu.memory_space<smem>>
    %c0 = arith.constant 0 : index
    %100 = arith.index_cast %6 : i32 to index
    %c0_3 = arith.constant 0 : index
    %101 = vector.load %arg3[%c0, %100, %c0_3] : memref<1x8x512xf32, #tpu.memory_space<vmem>>, vector<1x1x512xf32>
    %102 = vector.shape_cast %101 : vector<1x1x512xf32> to vector<512xf32>
    %c0_4 = arith.constant 0 : index
    %c0_5 = arith.constant 0 : index
    %c0_6 = arith.constant 0 : index
    %103 = vector.load %arg4[%c0_4, %c0_5, %c0_6] : memref<1x32x512xf32, #tpu.memory_space<vmem>>, vector<1x1x512xf32>
    %104 = vector.shape_cast %103 : vector<1x1x512xf32> to vector<512xf32>
    %105 = vector.shape_cast %102 : vector<512xf32> to vector<1x1x512xf32>
    tpu.vector_store %arg4[%c0_4, %c0_5, %c0_6], %105 {strides = array<i32>} : memref<1x32x512xf32, #tpu.memory_space<vmem>>, vector<1x1x512xf32>,
    %c0_7 = arith.constant 0 : index
    %106 = arith.index_cast %9 : i32 to index
    %c0_8 = arith.constant 0 : index
    %107 = vector.load %arg3[%c0_7, %106, %c0_8] : memref<1x8x512xf32, #tpu.memory_space<vmem>>, vector<1x1x512xf32>
    %108 = vector.shape_cast %107 : vector<1x1x512xf32> to vector<512xf32>
    %c0_9 = arith.constant 0 : index
    %c1 = arith.constant 1 : index
    %c0_10 = arith.constant 0 : index
    %109 = vector.load %arg4[%c0_9, %c1, %c0_10] : memref<1x32x512xf32, #tpu.memory_space<vmem>>, vector<1x1x512xf32>
    %110 = vector.shape_cast %109 : vector<1x1x512xf32> to vector<512xf32>
    %111 = vector.shape_cast %108 : vector<512xf32> to vector<1x1x512xf32>
    tpu.vector_store %arg4[%c0_9, %c1, %c0_10], %111 {strides = array<i32>} : memref<1x32x512xf32, #tpu.memory_space<vmem>>, vector<1x1x512xf32>,
    %c0_11 = arith.constant 0 : index
    %112 = arith.index_cast %12 : i32 to index
    %c0_12 = arith.constant 0 : index
    %113 = vector.load %arg3[%c0_11, %112, %c0_12] : memref<1x8x512xf32, #tpu.memory_space<vmem>>, vector<1x1x512xf32>
    %114 = vector.shape_cast %113 : vector<1x1x512xf32> to vector<512xf32>
    %c0_13 = arith.constant 0 : index
    %c2 = arith.constant 2 : index
    %c0_14 = arith.constant 0 : index
    %115 = vector.load %arg4[%c0_13, %c2, %c0_14] : memref<1x32x512xf32, #tpu.memory_space<vmem>>, vector<1x1x512xf32>
    %116 = vector.shape_cast %115 : vector<1x1x512xf32> to vector<512xf32>
    %117 = vector.shape_cast %114 : vector<512xf32> to vector<1x1x512xf32>
    tpu.vector_store %arg4[%c0_13, %c2, %c0_14], %117 {strides = array<i32>} : memref<1x32x512xf32, #tpu.memory_space<vmem>>, vector<1x1x512xf32>,
    %c0_15 = arith.constant 0 : index
    %118 = arith.index_cast %15 : i32 to index
    %c0_16 = arith.constant 0 : index
    %119 = vector.load %arg3[%c0_15, %118, %c0_16] : memref<1x8x512xf32, #tpu.memory_space<vmem>>, vector<1x1x512xf32>
    %120 = vector.shape_cast %119 : vector<1x1x512xf32> to vector<512xf32>
    %c0_17 = arith.constant 0 : index
    %c3 = arith.constant 3 : index
    %c0_18 = arith.constant 0 : index
    %121 = vector.load %arg4[%c0_17, %c3, %c0_18] : memref<1x32x512xf32, #tpu.memory_space<vmem>>, vector<1x1x512xf32>
    %122 = vector.shape_cast %121 : vector<1x1x512xf32> to vector<512xf32>
    %123 = vector.shape_cast %120 : vector<512xf32> to vector<1x1x512xf32>
    tpu.vector_store %arg4[%c0_17, %c3, %c0_18], %123 {strides = array<i32>} : memref<1x32x512xf32, #tpu.memory_space<vmem>>, vector<1x1x512xf32>,
    %c0_19 = arith.constant 0 : index
    %124 = arith.index_cast %18 : i32 to index
    %c0_20 = arith.constant 0 : index
    %125 = vector.load %arg3[%c0_19, %124, %c0_20] : memref<1x8x512xf32, #tpu.memory_space<vmem>>, vector<1x1x512xf32>
    %126 = vector.shape_cast %125 : vector<1x1x512xf32> to vector<512xf32>
    %c0_21 = arith.constant 0 : index
    %c4 = arith.constant 4 : index
    %c0_22 = arith.constant 0 : index
    %127 = vector.load %arg4[%c0_21, %c4, %c0_22] : memref<1x32x512xf32, #tpu.memory_space<vmem>>, vector<1x1x512xf32>
    %128 = vector.shape_cast %127 : vector<1x1x512xf32> to vector<512xf32>
    %129 = vector.shape_cast %126 : vector<512xf32> to vector<1x1x512xf32>
    tpu.vector_store %arg4[%c0_21, %c4, %c0_22], %129 {strides = array<i32>} : memref<1x32x512xf32, #tpu.memory_space<vmem>>, vector<1x1x512xf32>,
    %c0_23 = arith.constant 0 : index
    %130 = arith.index_cast %21 : i32 to index
    %c0_24 = arith.constant 0 : index
    %131 = vector.load %arg3[%c0_23, %130, %c0_24] : memref<1x8x512xf32, #tpu.memory_space<vmem>>, vector<1x1x512xf32>
    %132 = vector.shape_cast %131 : vector<1x1x512xf32> to vector<512xf32>
    %c0_25 = arith.constant 0 : index
    %c5 = arith.constant 5 : index
    %c0_26 = arith.constant 0 : index
    %133 = vector.load %arg4[%c0_25, %c5, %c0_26] : memref<1x32x512xf32, #tpu.memory_space<vmem>>, vector<1x1x512xf32>
    %134 = vector.shape_cast %133 : vector<1x1x512xf32> to vector<512xf32>
    %135 = vector.shape_cast %132 : vector<512xf32> to vector<1x1x512xf32>
    tpu.vector_store %arg4[%c0_25, %c5, %c0_26], %135 {strides = array<i32>} : memref<1x32x512xf32, #tpu.memory_space<vmem>>, vector<1x1x512xf32>,
    %c0_27 = arith.constant 0 : index
    %136 = arith.index_cast %24 : i32 to index
    %c0_28 = arith.constant 0 : index
    %137 = vector.load %arg3[%c0_27, %136, %c0_28] : memref<1x8x512xf32, #tpu.memory_space<vmem>>, vector<1x1x512xf32>
    %138 = vector.shape_cast %137 : vector<1x1x512xf32> to vector<512xf32>
    %c0_29 = arith.constant 0 : index
    %c6 = arith.constant 6 : index
    %c0_30 = arith.constant 0 : index
    %139 = vector.load %arg4[%c0_29, %c6, %c0_30] : memref<1x32x512xf32, #tpu.memory_space<vmem>>, vector<1x1x512xf32>
    %140 = vector.shape_cast %139 : vector<1x1x512xf32> to vector<512xf32>
    %141 = vector.shape_cast %138 : vector<512xf32> to vector<1x1x512xf32>
    tpu.vector_store %arg4[%c0_29, %c6, %c0_30], %141 {strides = array<i32>} : memref<1x32x512xf32, #tpu.memory_space<vmem>>, vector<1x1x512xf32>,
    %c0_31 = arith.constant 0 : index
    %142 = arith.index_cast %27 : i32 to index
    %c0_32 = arith.constant 0 : index
    %143 = vector.load %arg3[%c0_31, %142, %c0_32] : memref<1x8x512xf32, #tpu.memory_space<vmem>>, vector<1x1x512xf32>
    %144 = vector.shape_cast %143 : vector<1x1x512xf32> to vector<512xf32>
    %c0_33 = arith.constant 0 : index
    %c7 = arith.constant 7 : index
    %c0_34 = arith.constant 0 : index
    %145 = vector.load %arg4[%c0_33, %c7, %c0_34] : memref<1x32x512xf32, #tpu.memory_space<vmem>>, vector<1x1x512xf32>
    %146 = vector.shape_cast %145 : vector<1x1x512xf32> to vector<512xf32>
    %147 = vector.shape_cast %144 : vector<512xf32> to vector<1x1x512xf32>
    tpu.vector_store %arg4[%c0_33, %c7, %c0_34], %147 {strides = array<i32>} : memref<1x32x512xf32, #tpu.memory_space<vmem>>, vector<1x1x512xf32>,
    %c0_35 = arith.constant 0 : index
    %148 = arith.index_cast %30 : i32 to index
    %c0_36 = arith.constant 0 : index
    %149 = vector.load %arg3[%c0_35, %148, %c0_36] : memref<1x8x512xf32, #tpu.memory_space<vmem>>, vector<1x1x512xf32>
    %150 = vector.shape_cast %149 : vector<1x1x512xf32> to vector<512xf32>
    %c0_37 = arith.constant 0 : index
    %c8 = arith.constant 8 : index
    %c0_38 = arith.constant 0 : index
    %151 = vector.load %arg4[%c0_37, %c8, %c0_38] : memref<1x32x512xf32, #tpu.memory_space<vmem>>, vector<1x1x512xf32>
    %152 = vector.shape_cast %151 : vector<1x1x512xf32> to vector<512xf32>
    %153 = vector.shape_cast %150 : vector<512xf32> to vector<1x1x512xf32>
    tpu.vector_store %arg4[%c0_37, %c8, %c0_38], %153 {strides = array<i32>} : memref<1x32x512xf32, #tpu.memory_space<vmem>>, vector<1x1x512xf32>,
    %c0_39 = arith.constant 0 : index
    %154 = arith.index_cast %33 : i32 to index
    %c0_40 = arith.constant 0 : index
    %155 = vector.load %arg3[%c0_39, %154, %c0_40] : memref<1x8x512xf32, #tpu.memory_space<vmem>>, vector<1x1x512xf32>
    %156 = vector.shape_cast %155 : vector<1x1x512xf32> to vector<512xf32>
    %c0_41 = arith.constant 0 : index
    %c9 = arith.constant 9 : index
    %c0_42 = arith.constant 0 : index
    %157 = vector.load %arg4[%c0_41, %c9, %c0_42] : memref<1x32x512xf32, #tpu.memory_space<vmem>>, vector<1x1x512xf32>
    %158 = vector.shape_cast %157 : vector<1x1x512xf32> to vector<512xf32>
    %159 = vector.shape_cast %156 : vector<512xf32> to vector<1x1x512xf32>
    tpu.vector_store %arg4[%c0_41, %c9, %c0_42], %159 {strides = array<i32>} : memref<1x32x512xf32, #tpu.memory_space<vmem>>, vector<1x1x512xf32>,
    %c0_43 = arith.constant 0 : index
    %160 = arith.index_cast %36 : i32 to index
    %c0_44 = arith.constant 0 : index
    %161 = vector.load %arg3[%c0_43, %160, %c0_44] : memref<1x8x512xf32, #tpu.memory_space<vmem>>, vector<1x1x512xf32>
    %162 = vector.shape_cast %161 : vector<1x1x512xf32> to vector<512xf32>
    %c0_45 = arith.constant 0 : index
    %c10 = arith.constant 10 : index
    %c0_46 = arith.constant 0 : index
    %163 = vector.load %arg4[%c0_45, %c10, %c0_46] : memref<1x32x512xf32, #tpu.memory_space<vmem>>, vector<1x1x512xf32>
    %164 = vector.shape_cast %163 : vector<1x1x512xf32> to vector<512xf32>
    %165 = vector.shape_cast %162 : vector<512xf32> to vector<1x1x512xf32>
    tpu.vector_store %arg4[%c0_45, %c10, %c0_46], %165 {strides = array<i32>} : memref<1x32x512xf32, #tpu.memory_space<vmem>>, vector<1x1x512xf32>,
    %c0_47 = arith.constant 0 : index
    %166 = arith.index_cast %39 : i32 to index
    %c0_48 = arith.constant 0 : index
    %167 = vector.load %arg3[%c0_47, %166, %c0_48] : memref<1x8x512xf32, #tpu.memory_space<vmem>>, vector<1x1x512xf32>
    %168 = vector.shape_cast %167 : vector<1x1x512xf32> to vector<512xf32>
    %c0_49 = arith.constant 0 : index
    %c11 = arith.constant 11 : index
    %c0_50 = arith.constant 0 : index
    %169 = vector.load %arg4[%c0_49, %c11, %c0_50] : memref<1x32x512xf32, #tpu.memory_space<vmem>>, vector<1x1x512xf32>
    %170 = vector.shape_cast %169 : vector<1x1x512xf32> to vector<512xf32>
    %171 = vector.shape_cast %168 : vector<512xf32> to vector<1x1x512xf32>
    tpu.vector_store %arg4[%c0_49, %c11, %c0_50], %171 {strides = array<i32>} : memref<1x32x512xf32, #tpu.memory_space<vmem>>, vector<1x1x512xf32>,
    %c0_51 = arith.constant 0 : index
    %172 = arith.index_cast %42 : i32 to index
    %c0_52 = arith.constant 0 : index
    %173 = vector.load %arg3[%c0_51, %172, %c0_52] : memref<1x8x512xf32, #tpu.memory_space<vmem>>, vector<1x1x512xf32>
    %174 = vector.shape_cast %173 : vector<1x1x512xf32> to vector<512xf32>
    %c0_53 = arith.constant 0 : index
    %c12 = arith.constant 12 : index
    %c0_54 = arith.constant 0 : index
    %175 = vector.load %arg4[%c0_53, %c12, %c0_54] : memref<1x32x512xf32, #tpu.memory_space<vmem>>, vector<1x1x512xf32>
    %176 = vector.shape_cast %175 : vector<1x1x512xf32> to vector<512xf32>
    %177 = vector.shape_cast %174 : vector<512xf32> to vector<1x1x512xf32>
    tpu.vector_store %arg4[%c0_53, %c12, %c0_54], %177 {strides = array<i32>} : memref<1x32x512xf32, #tpu.memory_space<vmem>>, vector<1x1x512xf32>,
    %c0_55 = arith.constant 0 : index
    %178 = arith.index_cast %45 : i32 to index
    %c0_56 = arith.constant 0 : index
    %179 = vector.load %arg3[%c0_55, %178, %c0_56] : memref<1x8x512xf32, #tpu.memory_space<vmem>>, vector<1x1x512xf32>
    %180 = vector.shape_cast %179 : vector<1x1x512xf32> to vector<512xf32>
    %c0_57 = arith.constant 0 : index
    %c13 = arith.constant 13 : index
    %c0_58 = arith.constant 0 : index
    %181 = vector.load %arg4[%c0_57, %c13, %c0_58] : memref<1x32x512xf32, #tpu.memory_space<vmem>>, vector<1x1x512xf32>
    %182 = vector.shape_cast %181 : vector<1x1x512xf32> to vector<512xf32>
    %183 = vector.shape_cast %180 : vector<512xf32> to vector<1x1x512xf32>
    tpu.vector_store %arg4[%c0_57, %c13, %c0_58], %183 {strides = array<i32>} : memref<1x32x512xf32, #tpu.memory_space<vmem>>, vector<1x1x512xf32>,
    %c0_59 = arith.constant 0 : index
    %184 = arith.index_cast %48 : i32 to index
    %c0_60 = arith.constant 0 : index
    %185 = vector.load %arg3[%c0_59, %184, %c0_60] : memref<1x8x512xf32, #tpu.memory_space<vmem>>, vector<1x1x512xf32>
    %186 = vector.shape_cast %185 : vector<1x1x512xf32> to vector<512xf32>
    %c0_61 = arith.constant 0 : index
    %c14 = arith.constant 14 : index
    %c0_62 = arith.constant 0 : index
    %187 = vector.load %arg4[%c0_61, %c14, %c0_62] : memref<1x32x512xf32, #tpu.memory_space<vmem>>, vector<1x1x512xf32>
    %188 = vector.shape_cast %187 : vector<1x1x512xf32> to vector<512xf32>
    %189 = vector.shape_cast %186 : vector<512xf32> to vector<1x1x512xf32>
    tpu.vector_store %arg4[%c0_61, %c14, %c0_62], %189 {strides = array<i32>} : memref<1x32x512xf32, #tpu.memory_space<vmem>>, vector<1x1x512xf32>,
    %c0_63 = arith.constant 0 : index
    %190 = arith.index_cast %51 : i32 to index
    %c0_64 = arith.constant 0 : index
    %191 = vector.load %arg3[%c0_63, %190, %c0_64] : memref<1x8x512xf32, #tpu.memory_space<vmem>>, vector<1x1x512xf32>
    %192 = vector.shape_cast %191 : vector<1x1x512xf32> to vector<512xf32>
    %c0_65 = arith.constant 0 : index
    %c15 = arith.constant 15 : index
    %c0_66 = arith.constant 0 : index
    %193 = vector.load %arg4[%c0_65, %c15, %c0_66] : memref<1x32x512xf32, #tpu.memory_space<vmem>>, vector<1x1x512xf32>
    %194 = vector.shape_cast %193 : vector<1x1x512xf32> to vector<512xf32>
    %195 = vector.shape_cast %192 : vector<512xf32> to vector<1x1x512xf32>
    tpu.vector_store %arg4[%c0_65, %c15, %c0_66], %195 {strides = array<i32>} : memref<1x32x512xf32, #tpu.memory_space<vmem>>, vector<1x1x512xf32>,
    %c0_67 = arith.constant 0 : index
    %196 = arith.index_cast %54 : i32 to index
    %c0_68 = arith.constant 0 : index
    %197 = vector.load %arg3[%c0_67, %196, %c0_68] : memref<1x8x512xf32, #tpu.memory_space<vmem>>, vector<1x1x512xf32>
    %198 = vector.shape_cast %197 : vector<1x1x512xf32> to vector<512xf32>
    %c0_69 = arith.constant 0 : index
    %c16 = arith.constant 16 : index
    %c0_70 = arith.constant 0 : index
    %199 = vector.load %arg4[%c0_69, %c16, %c0_70] : memref<1x32x512xf32, #tpu.memory_space<vmem>>, vector<1x1x512xf32>
    %200 = vector.shape_cast %199 : vector<1x1x512xf32> to vector<512xf32>
    %201 = vector.shape_cast %198 : vector<512xf32> to vector<1x1x512xf32>
    tpu.vector_store %arg4[%c0_69, %c16, %c0_70], %201 {strides = array<i32>} : memref<1x32x512xf32, #tpu.memory_space<vmem>>, vector<1x1x512xf32>,
    %c0_71 = arith.constant 0 : index
    %202 = arith.index_cast %57 : i32 to index
    %c0_72 = arith.constant 0 : index
    %203 = vector.load %arg3[%c0_71, %202, %c0_72] : memref<1x8x512xf32, #tpu.memory_space<vmem>>, vector<1x1x512xf32>
    %204 = vector.shape_cast %203 : vector<1x1x512xf32> to vector<512xf32>
    %c0_73 = arith.constant 0 : index
    %c17 = arith.constant 17 : index
    %c0_74 = arith.constant 0 : index
    %205 = vector.load %arg4[%c0_73, %c17, %c0_74] : memref<1x32x512xf32, #tpu.memory_space<vmem>>, vector<1x1x512xf32>
    %206 = vector.shape_cast %205 : vector<1x1x512xf32> to vector<512xf32>
    %207 = vector.shape_cast %204 : vector<512xf32> to vector<1x1x512xf32>
    tpu.vector_store %arg4[%c0_73, %c17, %c0_74], %207 {strides = array<i32>} : memref<1x32x512xf32, #tpu.memory_space<vmem>>, vector<1x1x512xf32>,
    %c0_75 = arith.constant 0 : index
    %208 = arith.index_cast %60 : i32 to index
    %c0_76 = arith.constant 0 : index
    %209 = vector.load %arg3[%c0_75, %208, %c0_76] : memref<1x8x512xf32, #tpu.memory_space<vmem>>, vector<1x1x512xf32>
    %210 = vector.shape_cast %209 : vector<1x1x512xf32> to vector<512xf32>
    %c0_77 = arith.constant 0 : index
    %c18 = arith.constant 18 : index
    %c0_78 = arith.constant 0 : index
    %211 = vector.load %arg4[%c0_77, %c18, %c0_78] : memref<1x32x512xf32, #tpu.memory_space<vmem>>, vector<1x1x512xf32>
    %212 = vector.shape_cast %211 : vector<1x1x512xf32> to vector<512xf32>
    %213 = vector.shape_cast %210 : vector<512xf32> to vector<1x1x512xf32>
    tpu.vector_store %arg4[%c0_77, %c18, %c0_78], %213 {strides = array<i32>} : memref<1x32x512xf32, #tpu.memory_space<vmem>>, vector<1x1x512xf32>,
    %c0_79 = arith.constant 0 : index
    %214 = arith.index_cast %63 : i32 to index
    %c0_80 = arith.constant 0 : index
    %215 = vector.load %arg3[%c0_79, %214, %c0_80] : memref<1x8x512xf32, #tpu.memory_space<vmem>>, vector<1x1x512xf32>
    %216 = vector.shape_cast %215 : vector<1x1x512xf32> to vector<512xf32>
    %c0_81 = arith.constant 0 : index
    %c19 = arith.constant 19 : index
    %c0_82 = arith.constant 0 : index
    %217 = vector.load %arg4[%c0_81, %c19, %c0_82] : memref<1x32x512xf32, #tpu.memory_space<vmem>>, vector<1x1x512xf32>
    %218 = vector.shape_cast %217 : vector<1x1x512xf32> to vector<512xf32>
    %219 = vector.shape_cast %216 : vector<512xf32> to vector<1x1x512xf32>
    tpu.vector_store %arg4[%c0_81, %c19, %c0_82], %219 {strides = array<i32>} : memref<1x32x512xf32, #tpu.memory_space<vmem>>, vector<1x1x512xf32>,
    %c0_83 = arith.constant 0 : index
    %220 = arith.index_cast %66 : i32 to index
    %c0_84 = arith.constant 0 : index
    %221 = vector.load %arg3[%c0_83, %220, %c0_84] : memref<1x8x512xf32, #tpu.memory_space<vmem>>, vector<1x1x512xf32>
    %222 = vector.shape_cast %221 : vector<1x1x512xf32> to vector<512xf32>
    %c0_85 = arith.constant 0 : index
    %c20 = arith.constant 20 : index
    %c0_86 = arith.constant 0 : index
    %223 = vector.load %arg4[%c0_85, %c20, %c0_86] : memref<1x32x512xf32, #tpu.memory_space<vmem>>, vector<1x1x512xf32>
    %224 = vector.shape_cast %223 : vector<1x1x512xf32> to vector<512xf32>
    %225 = vector.shape_cast %222 : vector<512xf32> to vector<1x1x512xf32>
    tpu.vector_store %arg4[%c0_85, %c20, %c0_86], %225 {strides = array<i32>} : memref<1x32x512xf32, #tpu.memory_space<vmem>>, vector<1x1x512xf32>,
    %c0_87 = arith.constant 0 : index
    %226 = arith.index_cast %69 : i32 to index
    %c0_88 = arith.constant 0 : index
    %227 = vector.load %arg3[%c0_87, %226, %c0_88] : memref<1x8x512xf32, #tpu.memory_space<vmem>>, vector<1x1x512xf32>
    %228 = vector.shape_cast %227 : vector<1x1x512xf32> to vector<512xf32>
    %c0_89 = arith.constant 0 : index
    %c21 = arith.constant 21 : index
    %c0_90 = arith.constant 0 : index
    %229 = vector.load %arg4[%c0_89, %c21, %c0_90] : memref<1x32x512xf32, #tpu.memory_space<vmem>>, vector<1x1x512xf32>
    %230 = vector.shape_cast %229 : vector<1x1x512xf32> to vector<512xf32>
    %231 = vector.shape_cast %228 : vector<512xf32> to vector<1x1x512xf32>
    tpu.vector_store %arg4[%c0_89, %c21, %c0_90], %231 {strides = array<i32>} : memref<1x32x512xf32, #tpu.memory_space<vmem>>, vector<1x1x512xf32>,
    %c0_91 = arith.constant 0 : index
    %232 = arith.index_cast %72 : i32 to index
    %c0_92 = arith.constant 0 : index
    %233 = vector.load %arg3[%c0_91, %232, %c0_92] : memref<1x8x512xf32, #tpu.memory_space<vmem>>, vector<1x1x512xf32>
    %234 = vector.shape_cast %233 : vector<1x1x512xf32> to vector<512xf32>
    %c0_93 = arith.constant 0 : index
    %c22 = arith.constant 22 : index
    %c0_94 = arith.constant 0 : index
    %235 = vector.load %arg4[%c0_93, %c22, %c0_94] : memref<1x32x512xf32, #tpu.memory_space<vmem>>, vector<1x1x512xf32>
    %236 = vector.shape_cast %235 : vector<1x1x512xf32> to vector<512xf32>
    %237 = vector.shape_cast %234 : vector<512xf32> to vector<1x1x512xf32>
    tpu.vector_store %arg4[%c0_93, %c22, %c0_94], %237 {strides = array<i32>} : memref<1x32x512xf32, #tpu.memory_space<vmem>>, vector<1x1x512xf32>,
    %c0_95 = arith.constant 0 : index
    %238 = arith.index_cast %75 : i32 to index
    %c0_96 = arith.constant 0 : index
    %239 = vector.load %arg3[%c0_95, %238, %c0_96] : memref<1x8x512xf32, #tpu.memory_space<vmem>>, vector<1x1x512xf32>
    %240 = vector.shape_cast %239 : vector<1x1x512xf32> to vector<512xf32>
    %c0_97 = arith.constant 0 : index
    %c23 = arith.constant 23 : index
    %c0_98 = arith.constant 0 : index
    %241 = vector.load %arg4[%c0_97, %c23, %c0_98] : memref<1x32x512xf32, #tpu.memory_space<vmem>>, vector<1x1x512xf32>
    %242 = vector.shape_cast %241 : vector<1x1x512xf32> to vector<512xf32>
    %243 = vector.shape_cast %240 : vector<512xf32> to vector<1x1x512xf32>
    tpu.vector_store %arg4[%c0_97, %c23, %c0_98], %243 {strides = array<i32>} : memref<1x32x512xf32, #tpu.memory_space<vmem>>, vector<1x1x512xf32>,
    %c0_99 = arith.constant 0 : index
    %244 = arith.index_cast %78 : i32 to index
    %c0_100 = arith.constant 0 : index
    %245 = vector.load %arg3[%c0_99, %244, %c0_100] : memref<1x8x512xf32, #tpu.memory_space<vmem>>, vector<1x1x512xf32>
    %246 = vector.shape_cast %245 : vector<1x1x512xf32> to vector<512xf32>
    %c0_101 = arith.constant 0 : index
    %c24 = arith.constant 24 : index
    %c0_102 = arith.constant 0 : index
    %247 = vector.load %arg4[%c0_101, %c24, %c0_102] : memref<1x32x512xf32, #tpu.memory_space<vmem>>, vector<1x1x512xf32>
    %248 = vector.shape_cast %247 : vector<1x1x512xf32> to vector<512xf32>
    %249 = vector.shape_cast %246 : vector<512xf32> to vector<1x1x512xf32>
    tpu.vector_store %arg4[%c0_101, %c24, %c0_102], %249 {strides = array<i32>} : memref<1x32x512xf32, #tpu.memory_space<vmem>>, vector<1x1x512xf32>,
    %c0_103 = arith.constant 0 : index
    %250 = arith.index_cast %81 : i32 to index
    %c0_104 = arith.constant 0 : index
    %251 = vector.load %arg3[%c0_103, %250, %c0_104] : memref<1x8x512xf32, #tpu.memory_space<vmem>>, vector<1x1x512xf32>
    %252 = vector.shape_cast %251 : vector<1x1x512xf32> to vector<512xf32>
    %c0_105 = arith.constant 0 : index
    %c25 = arith.constant 25 : index
    %c0_106 = arith.constant 0 : index
    %253 = vector.load %arg4[%c0_105, %c25, %c0_106] : memref<1x32x512xf32, #tpu.memory_space<vmem>>, vector<1x1x512xf32>
    %254 = vector.shape_cast %253 : vector<1x1x512xf32> to vector<512xf32>
    %255 = vector.shape_cast %252 : vector<512xf32> to vector<1x1x512xf32>
    tpu.vector_store %arg4[%c0_105, %c25, %c0_106], %255 {strides = array<i32>} : memref<1x32x512xf32, #tpu.memory_space<vmem>>, vector<1x1x512xf32>,
    %c0_107 = arith.constant 0 : index
    %256 = arith.index_cast %84 : i32 to index
    %c0_108 = arith.constant 0 : index
    %257 = vector.load %arg3[%c0_107, %256, %c0_108] : memref<1x8x512xf32, #tpu.memory_space<vmem>>, vector<1x1x512xf32>
    %258 = vector.shape_cast %257 : vector<1x1x512xf32> to vector<512xf32>
    %c0_109 = arith.constant 0 : index
    %c26 = arith.constant 26 : index
    %c0_110 = arith.constant 0 : index
    %259 = vector.load %arg4[%c0_109, %c26, %c0_110] : memref<1x32x512xf32, #tpu.memory_space<vmem>>, vector<1x1x512xf32>
    %260 = vector.shape_cast %259 : vector<1x1x512xf32> to vector<512xf32>
    %261 = vector.shape_cast %258 : vector<512xf32> to vector<1x1x512xf32>
    tpu.vector_store %arg4[%c0_109, %c26, %c0_110], %261 {strides = array<i32>} : memref<1x32x512xf32, #tpu.memory_space<vmem>>, vector<1x1x512xf32>,
    %c0_111 = arith.constant 0 : index
    %262 = arith.index_cast %87 : i32 to index
    %c0_112 = arith.constant 0 : index
    %263 = vector.load %arg3[%c0_111, %262, %c0_112] : memref<1x8x512xf32, #tpu.memory_space<vmem>>, vector<1x1x512xf32>
    %264 = vector.shape_cast %263 : vector<1x1x512xf32> to vector<512xf32>
    %c0_113 = arith.constant 0 : index
    %c27 = arith.constant 27 : index
    %c0_114 = arith.constant 0 : index
    %265 = vector.load %arg4[%c0_113, %c27, %c0_114] : memref<1x32x512xf32, #tpu.memory_space<vmem>>, vector<1x1x512xf32>
    %266 = vector.shape_cast %265 : vector<1x1x512xf32> to vector<512xf32>
    %267 = vector.shape_cast %264 : vector<512xf32> to vector<1x1x512xf32>
    tpu.vector_store %arg4[%c0_113, %c27, %c0_114], %267 {strides = array<i32>} : memref<1x32x512xf32, #tpu.memory_space<vmem>>, vector<1x1x512xf32>,
    %c0_115 = arith.constant 0 : index
    %268 = arith.index_cast %90 : i32 to index
    %c0_116 = arith.constant 0 : index
    %269 = vector.load %arg3[%c0_115, %268, %c0_116] : memref<1x8x512xf32, #tpu.memory_space<vmem>>, vector<1x1x512xf32>
    %270 = vector.shape_cast %269 : vector<1x1x512xf32> to vector<512xf32>
    %c0_117 = arith.constant 0 : index
    %c28 = arith.constant 28 : index
    %c0_118 = arith.constant 0 : index
    %271 = vector.load %arg4[%c0_117, %c28, %c0_118] : memref<1x32x512xf32, #tpu.memory_space<vmem>>, vector<1x1x512xf32>
    %272 = vector.shape_cast %271 : vector<1x1x512xf32> to vector<512xf32>
    %273 = vector.shape_cast %270 : vector<512xf32> to vector<1x1x512xf32>
    tpu.vector_store %arg4[%c0_117, %c28, %c0_118], %273 {strides = array<i32>} : memref<1x32x512xf32, #tpu.memory_space<vmem>>, vector<1x1x512xf32>,
    %c0_119 = arith.constant 0 : index
    %274 = arith.index_cast %93 : i32 to index
    %c0_120 = arith.constant 0 : index
    %275 = vector.load %arg3[%c0_119, %274, %c0_120] : memref<1x8x512xf32, #tpu.memory_space<vmem>>, vector<1x1x512xf32>
    %276 = vector.shape_cast %275 : vector<1x1x512xf32> to vector<512xf32>
    %c0_121 = arith.constant 0 : index
    %c29 = arith.constant 29 : index
    %c0_122 = arith.constant 0 : index
    %277 = vector.load %arg4[%c0_121, %c29, %c0_122] : memref<1x32x512xf32, #tpu.memory_space<vmem>>, vector<1x1x512xf32>
    %278 = vector.shape_cast %277 : vector<1x1x512xf32> to vector<512xf32>
    %279 = vector.shape_cast %276 : vector<512xf32> to vector<1x1x512xf32>
    tpu.vector_store %arg4[%c0_121, %c29, %c0_122], %279 {strides = array<i32>} : memref<1x32x512xf32, #tpu.memory_space<vmem>>, vector<1x1x512xf32>,
    %c0_123 = arith.constant 0 : index
    %280 = arith.index_cast %96 : i32 to index
    %c0_124 = arith.constant 0 : index
    %281 = vector.load %arg3[%c0_123, %280, %c0_124] : memref<1x8x512xf32, #tpu.memory_space<vmem>>, vector<1x1x512xf32>
    %282 = vector.shape_cast %281 : vector<1x1x512xf32> to vector<512xf32>
    %c0_125 = arith.constant 0 : index
    %c30 = arith.constant 30 : index
    %c0_126 = arith.constant 0 : index
    %283 = vector.load %arg4[%c0_125, %c30, %c0_126] : memref<1x32x512xf32, #tpu.memory_space<vmem>>, vector<1x1x512xf32>
    %284 = vector.shape_cast %283 : vector<1x1x512xf32> to vector<512xf32>
    %285 = vector.shape_cast %282 : vector<512xf32> to vector<1x1x512xf32>
    tpu.vector_store %arg4[%c0_125, %c30, %c0_126], %285 {strides = array<i32>} : memref<1x32x512xf32, #tpu.memory_space<vmem>>, vector<1x1x512xf32>,
    %c0_127 = arith.constant 0 : index
    %286 = arith.index_cast %99 : i32 to index
    %c0_128 = arith.constant 0 : index
    %287 = vector.load %arg3[%c0_127, %286, %c0_128] : memref<1x8x512xf32, #tpu.memory_space<vmem>>, vector<1x1x512xf32>
    %288 = vector.shape_cast %287 : vector<1x1x512xf32> to vector<512xf32>
    %c0_129 = arith.constant 0 : index
    %c31 = arith.constant 31 : index
    %c0_130 = arith.constant 0 : index
    %289 = vector.load %arg4[%c0_129, %c31, %c0_130] : memref<1x32x512xf32, #tpu.memory_space<vmem>>, vector<1x1x512xf32>
    %290 = vector.shape_cast %289 : vector<1x1x512xf32> to vector<512xf32>
    %291 = vector.shape_cast %288 : vector<512xf32> to vector<1x1x512xf32>
    tpu.vector_store %arg4[%c0_129, %c31, %c0_130], %291 {strides = array<i32>} : memref<1x32x512xf32, #tpu.memory_space<vmem>>, vector<1x1x512xf32>,
    return
  }
  func.func @transform_0(%arg0: i32, %arg1: i32, %arg2: memref<64xi32, #tpu.memory_space<smem>>) -> (i32, i32, i32) {
    %c0_i32 = arith.constant 0 : i32
    %c0_i32_0 = arith.constant 0 : i32
    %c0_i32_1 = arith.constant 0 : i32
    return %arg0, %c0_i32, %c0_i32_0 : i32, i32, i32
  }
  func.func @transform_1(%arg0: i32, %arg1: i32, %arg2: memref<64xi32, #tpu.memory_space<smem>>) -> (i32, i32, i32) {
    %c0_i32 = arith.constant 0 : i32
    %c0_i32_0 = arith.constant 0 : i32
    return %arg0, %arg1, %c0_i32 : i32, i32, i32
  }
}

</mosaic_0001>

<bundles_post_ra>
// kernel: tpu_custom_call.1
= control target key start
LH: loop header
LB: loop body
LE: loop exit
PB: predicated region body
PF: predicated region fallthrough
CT: control target
= control target key end

     0   :  { %s1581_s0 = inlined_call_operand.hbm [shape: s32[64], index: 0, kind: input, shape index: {}]   ;;  %s1582_s1 = inlined_call_operand.hbm [shape: f32[2,8,512], index: 1, kind: input, shape index: {}]   ;;  %s1583_s2 = inlined_call_operand.hbm [shape: f32[2,32,512], index: 2, kind: output, shape index: {}]  }
   0x1   :  { %1586 = sst [smem:[#allocation12_spill]] %s1582_s1  ;;  %s1016_s11 = scalar_lea.hbm %s1581_s0, 16 }
   0x2   :  { %p1017_p0 = scmp.ne.s32.totalorder %s1581_s0, %s1016_s11  ;;  %p1020_p1 = scmp.lt.u32.totalorder %s1016_s11, %s1581_s0 }
   0x4   :  { %p1022_p2 = pnand %p1020_p1, %p1017_p0 }
   0x6   :  { %1025 = shalt.err (!%p1022_p2)  }
   0x7   :  { %s1142_s16 = smov [#allocation3]  }
   0x8   :  { %8 = dma.hbm_to_smem %s1581_s0, 16, %s1142_s16, [#allocation2] }
   0x9   :  { %1108 = dma.done.wait [#allocation2], 16 }
   0xa   :  { %1109 = vsyncadd [#allocation2], 4294967280 }
   0xb   :  { %10 = sfence }
   0xc   :  { %11 = vsyncpa [#allocation5], 0 }
   0xd   :  { %13 = vsyncpa [#allocation5 + $0x1], 0 }
   0xe   :  { %14 = vsyncpa [#allocation6], 0 }
   0xf   :  { %16 = vsyncpa [#allocation6 + $0x1], 0  ;;  %s1174_s19 = smov 0   ;;  %s1176_s20 = smov 0  }
  0x10   :  { %s1178_s21 = smov 0   ;;  %s1180_s22 = smov 0  }
  0x11   :  { %s1182_s23 = smov 0   ;;  %s1184_s24 = smov 0  }
  0x12 LB: > { %s804_s0 = sadd.s32 4294967295, %s1140_s24   ;;  %s805_s25 = sadd.s32 4294967294, %s1140_s24   ;;  %s1140_s24 = sphi %s1184_s24, %s22_s24   ;;  %s1136_s23 = sphi %s1182_s23, %s1607_s23   ;;  %s1132_s22 = sphi %s1180_s22, %s1606_s22   ;;  %s1128_s21 = sphi %s1178_s21, %s1605_s21   ;;  %s1124_s20 = sphi %s1176_s20, %s1604_s20   ;;  %s1120_s19 = sphi %s1174_s19, %s1603_s19  }
  0x13   : > { %s34_s26 = sadd.s32 1, %s1136_s23  ;;  %s41_s27 = sadd.s32 1, %s1128_s21 }
  0x14   : > { %p36_p3 = scmp.ge.s32.totalorder %s34_s26, 2  ;;  %p48_p4 = scmp.ne.s32.totalorder %s1128_s21, %s1124_s20 }
  0x15   : > { %p49_p5 = scmp.eq.s32.totalorder %s1140_s24, 0  ;;  %p54_p6 = scmp.ne.s32.totalorder %s1124_s20, %s1120_s19 }
  0x16   : > { %s1609_s26 = smov (%p36_p3, %s34_s26), 0  ;;  %p55_p8 = scmp.eq.s32.totalorder %s804_s0, 0 }
  0x17   : > { %1587 = sst [smem:[#allocation11_spill]] %s1609_s26  ;;  %p1215_p7 = por %p49_p5, %p48_p4 }
  0x18   : > { %s38_s29 = ssub.s32 %s1136_s23, %s1609_s26  ;;  %p80_p9 = scmp.eq.s32.totalorder %s804_s0, 1 }
  0x19   : > { %p39_p10 = scmp.eq.s32.totalorder %s38_s29, 0  ;;  %p1221_p11 = por %p55_p8, %p54_p6 }
  0x1a   : > { %p1225_p12 = por %p80_p9, %p48_p4  ;;  %p86_p13 = scmp.eq.s32.totalorder %s805_s25, 1 }
  0x1b   : > { %s1230_s4 = scalar_select %p39_p10, %s1128_s21, %s41_s27  }
  0x1c   : > { %s1590_s3 = scalar_select %p1225_p12, 1, 0 }
  0x1d   : > { %p1232_p0 = por %p86_p13, %p54_p6  ;;  %p963_p2 = scmp.lt.s32.totalorder %s1140_s24, 2 }
  0x1e   : > { %s106_s6 = sand.u32 1, %s1128_s21   ;;  %s916_s8 = sshll.u32 %s1136_s23, 9 }
  0x1f   : > { %s1591_s5 = scalar_select %p1232_p0, 1, 0 }
  0x20   : > { %s808_s7 = sshll.u32 %s106_s6, 5  ;;  %s1592_s1 = sld [smem:[#allocation12_spill]] }
  0x21   : > { %s110_s12 = scalar_lea.vmem [#allocation4], %s808_s7  ;;  %p1249_p3 = pnand %p963_p2, %p1215_p7 }
  0x22   : > { %s118_s13 = sshll.u32 %s110_s12, 4  ;;  %s107_s15 = scalar_lea.sflag [#allocation5], %s106_s6  ;;  %s1245_s13 = int_to_ptr.vmem [resolvable:$true] %s118_s13 }
  0x23   : > { %p1028_p8 = pneg %p1249_p3 }
  0x26   : > { %s1243_s11 = scalar_lea.hbm %s1592_s1, %s916_s8  ;;  %s1031_s0 = scalar_lea.hbm %s1592_s1, 1024 }
  0x27   : > { %s1026_s16 = scalar_lea.hbm %s1243_s11, 512  ;;  %p1032_p7 = scmp.lt.u32.totalorder %s1243_s11, %s1592_s1 }
  0x28   : > { %p1027_p6 = scmp.ne.s32.totalorder %s1243_s11, %s1026_s16  ;;  %p1033_p13 = scmp.lt.u32.totalorder %s1031_s0, %s1026_s16 }
  0x29   : > { %p1035_p1 = scmp.lt.u32.totalorder %s1026_s16, %s1243_s11 }
  0x2a   : > { %p1029_p9 = pnand %p1028_p8, %p1027_p6  ;;  %p1034_p2 = por %p1033_p13, %p1032_p7 }
  0x2c   : > { %p1030_p10 = pneg %p1029_p9  ;;  %p1036_p4 = por %p1035_p1, %p1034_p2 }
  0x2e   : > { %p1037_p5 = pnand %p1036_p4, %p1030_p10 }
  0x30   : > { %1040 = shalt.err (!%p1037_p5)
}
  0x31   : > { %s1041_s28 = scalar_lea.vmem %s1245_s13, 512  ;;  %s1143_s29 = smov [#allocation4]  }
  0x32   : > { %p1042_p6 = scmp.ne.s32.totalorder %s1245_s13, %s1041_s28  ;;  %s1046_s6 = sshll.u32 %s1143_s29, 4  ;;  %s1047_s6 = int_to_ptr.vmem [resolvable:$false] %s1046_s6 }
  0x33   : > { %s1048_s7 = scalar_lea.vmem %s1047_s6, 1024  ;;  %p1049_p12 = scmp.lt.s32.totalorder %s1245_s13, %s1047_s6 }
  0x34   : > { %p1044_p9 = pnand %p1042_p6, %p1028_p8  ;;  %p1050_p7 = scmp.lt.s32.totalorder %s1048_s7, %s1041_s28 }
  0x36   : > { %p1045_p0 = pneg %p1044_p9  ;;  %p1051_p13 = por %p1050_p7, %p1049_p12 }
  0x38   : > { %p1052_p1 = pnand %p1051_p13, %p1045_p0 }
  0x3a   : > { %1055 = shalt.err (!%p1052_p1)
}
  0x3b   : > { %958 = dma.hbm_to_vmem [thread:$0]  (!%p1249_p3), %s1243_s11, 512, %s1245_s13, %s107_s15  }
  0x3c   : > { %p1594_p4 = scmp.lt.s32.totalorder %s1140_s24, 3  ;;  %p1595_p5 = scmp.ge.s32.totalorder %s1140_s24, 1 }
  0x3e   : > { %p124_p8 = pnand %p1595_p5, %p1594_p4 }
  0x3f   : > { %s1285_s8 = sand.u32 (!%p124_p8), 1, %s1124_s20  }
  0x40   : > { %127 = sbr.rel (%p124_p8) target bundleno = 212 (0xd4), region = 24  ;;  %s812_s9 = sshll.u32 (!%p124_p8), %s1285_s8, 5 }
  0x41   : > { %s130_s10 = scalar_lea.sflag (!%p124_p8), [#allocation5], %s1285_s8  ;;  %s1289_s12 = scalar_lea.vmem (!%p124_p8), [#allocation4], %s812_s9 }
  0x47   : > { %1111 = dma.done.wait (%p1221_p11), %s130_s10, 512  }
  0x48   : > { %1113 = vsyncadd (%p1221_p11), %s130_s10, 4294966784  ;;  %s813_s11 = sshll.u32 %s1285_s8, 7  ;;  %s1297_s13 = sshll.u32 %s1132_s22, 5  ;;  %v229_v0 = vlaneseq }
  0x49   : > { %s157_s14 = sld [smem:[#allocation3 + %s1297_s13]]  ;;  %s158_s15 = sadd.s32 1, %s1297_s13 }
  0x4a   : > { %s160_s16 = sadd.s32 2, %s1297_s13  ;;  %s159_s17 = sld [smem:[#allocation3 + %s158_s15]]  ;;  %vm1312_vm0 = vcmp.lt.s32.totalorder %v229_v0, 512 }
  0x4b   : > { %s161_s18 = sld [smem:[#allocation3 + %s160_s16]]  ;;  %s162_s30 = sadd.s32 3, %s1297_s13 }
  0x4c   : > { %s164_s0 = sadd.s32 4, %s1297_s13  ;;  %s1304_s25 = sld [smem:[#allocation3 + %s162_s30]] }
  0x4d   : > { %s1306_s27 = sld [smem:[#allocation3 + %s164_s0]]  ;;  %s166_s28 = sadd.s32 5, %s1297_s13 }
  0x4e   : > { %s1310_s10 = sld [smem:[#allocation3 + %s166_s28]]  ;;  %s1317_s26 = scalar_lea.vmem [#allocation7], %s813_s11 }
  0x4f   : > { %s220_s6 = sshra.s32 %s157_s14, 3  ;;  %s223_s7 = sand.u32 7, %s157_s14 }
  0x50   : > { %s918_s9 = sshll.u32 %s220_s6, 5  ;;  %s235_s15 = sshra.s32 %s159_s17, 3 }
  0x51   : > { %s226_s1 = sadd.s32 %s918_s9, %s223_s7  ;;  %s238_s30 = sand.u32 7, %s159_s17 }
  0x52   : > { %s227_s16 = scalar_lea.vmem %s1289_s12, %s226_s1 [#allocation4]  ;;  %s919_s0 = sshll.u32 %s235_s15, 5 }
  0x53   : > { %v228_v2 = vld [vmem:[%s227_s16] ss:$8 sm:$0xf]  ;;  %s247_s29 = sshra.s32 %s161_s18, 3  ;;  %s241_s14 = sadd.s32 %s919_s0, %s238_s30 }
  0x54   : > { %233 = vst.msk [vmem:[%s1317_s26] ss:$8 sm:$0xf] %vm1312_vm0, %v228_v2  ;;  %s250_s28 = sand.u32 7, %s161_s18  ;;  %s242_s6 = scalar_lea.vmem %s1289_s12, %s241_s14 [#allocation4] }
  0x55   : > { %s920_s1 = sshll.u32 %s247_s29, 5  ;;  %v243_v3 = vld [vmem:[%s242_s6] ss:$8 sm:$0xf]  ;;  %s259_s7 = sshra.s32 %s1304_s25, 3 }
  0x56   : > { %s253_s17 = sadd.s32 %s920_s1, %s250_s28  ;;  %820 = vst.msk [vmem:[%s1317_s26 + $0x1] ss:$8 sm:$0xf] %vm1312_vm0, %v243_v3  ;;  %s262_s9 = sand.u32 7, %s1304_s25 }
  0x57   : > { %s254_s11 = scalar_lea.vmem %s1289_s12, %s253_s17 [#allocation4]  ;;  %s921_s15 = sshll.u32 %s259_s7, 5 }
  0x58   : > { %v255_v4 = vld [vmem:[%s254_s11] ss:$8 sm:$0xf]  ;;  %s271_s16 = sshra.s32 %s1306_s27, 3  ;;  %s265_s18 = sadd.s32 %s921_s15, %s262_s9 }
  0x59   : > { %823 = vst.msk [vmem:[%s1317_s26 + $0x2] ss:$8 sm:$0xf] %vm1312_vm0, %v255_v4  ;;  %s274_s29 = sand.u32 7, %s1306_s27  ;;  %s266_s30 = scalar_lea.vmem %s1289_s12, %s265_s18 [#allocation4] }
  0x5a   : > { %s922_s0 = sshll.u32 %s271_s16, 5  ;;  %v267_v5 = vld [vmem:[%s266_s30] ss:$8 sm:$0xf]  ;;  %s283_s25 = sshra.s32 %s1310_s10, 3 }
  0x5b   : > { %s277_s14 = sadd.s32 %s922_s0, %s274_s29  ;;  %826 = vst.msk [vmem:[%s1317_s26 + $0x3] ss:$8 sm:$0xf] %vm1312_vm0, %v267_v5  ;;  %s286_s6 = sand.u32 7, %s1310_s10 }
  0x5c   : > { %s278_s28 = scalar_lea.vmem %s1289_s12, %s277_s14 [#allocation4]  ;;  %s923_s1 = sshll.u32 %s283_s25, 5 }
  0x5d   : > { %v279_v6 = vld [vmem:[%s278_s28] ss:$8 sm:$0xf]  ;;  %s1598_s17 = sadd.s32 6, %s1297_s13  ;;  %s289_s27 = sadd.s32 %s923_s1, %s286_s6 }
  0x5e   : > { %s169_s7 = sld [smem:[#allocation3 + %s1598_s17]]  ;;  %829 = vst.msk [vmem:[%s1317_s26 + $0x4] ss:$8 sm:$0xf] %vm1312_vm0, %v279_v6  ;;  %s170_s11 = sadd.s32 7, %s1297_s13 }
  0x5f   : > { %s290_s9 = scalar_lea.vmem %s1289_s12, %s289_s27 [#allocation4]  ;;  %s171_s15 = sld [smem:[#allocation3 + %s170_s11]] }
  0x60   : > { %v291_v7 = vld [vmem:[%s290_s9] ss:$8 sm:$0xf]  ;;  %s172_s16 = sadd.s32 8, %s1297_s13  ;;  %s174_s18 = sadd.s32 9, %s1297_s13 }
  0x61   : > { %832 = vst.msk [vmem:[%s1317_s26 + $0x5] ss:$8 sm:$0xf] %vm1312_vm0, %v291_v7  ;;  %s173_s10 = sld [smem:[#allocation3 + %s172_s16]]  ;;  %s176_s30 = sadd.s32 10, %s1297_s13 }
  0x62   : > { %s1353_s29 = sld [smem:[#allocation3 + %s174_s18]]  ;;  %s178_s0 = sadd.s32 11, %s1297_s13 }
  0x63   : > { %s1357_s6 = sld [smem:[#allocation3 + %s176_s30]]  ;;  %p1599_p12 = scmp.ne.s32.totalorder %s1590_s3, 0 }
  0x64   : > { %s295_s14 = sshra.s32 %s169_s7, 3  ;;  %s298_s25 = sand.u32 7, %s169_s7 }
  0x65   : > { %s924_s28 = sshll.u32 %s295_s14, 5  ;;  %s307_s17 = sshra.s32 %s171_s15, 3 }
  0x66   : > { %s301_s1 = sadd.s32 %s924_s28, %s298_s25  ;;  %s310_s11 = sand.u32 7, %s171_s15 }
  0x67   : > { %s302_s27 = scalar_lea.vmem %s1289_s12, %s301_s1 [#allocation4]  ;;  %s925_s9 = sshll.u32 %s307_s17, 5 }
  0x68   : > { %v303_v8 = vld [vmem:[%s302_s27] ss:$8 sm:$0xf]  ;;  %s319_s16 = sshra.s32 %s173_s10, 3  ;;  %s313_s7 = sadd.s32 %s925_s9, %s310_s11 }
  0x69   : > { %835 = vst.msk [vmem:[%s1317_s26 + $0x6] ss:$8 sm:$0xf] %vm1312_vm0, %v303_v8  ;;  %s322_s18 = sand.u32 7, %s173_s10  ;;  %s314_s30 = scalar_lea.vmem %s1289_s12, %s313_s7 [#allocation4] }
  0x6a   : > { %s926_s14 = sshll.u32 %s319_s16, 5  ;;  %v315_v9 = vld [vmem:[%s314_s30] ss:$8 sm:$0xf]  ;;  %s331_s28 = sshra.s32 %s1353_s29, 3 }
  0x6b   : > { %s325_s25 = sadd.s32 %s926_s14, %s322_s18  ;;  %838 = vst.msk [vmem:[%s1317_s26 + $0x7] ss:$8 sm:$0xf] %vm1312_vm0, %v315_v9  ;;  %s334_s1 = sand.u32 7, %s1353_s29 }
  0x6c   : > { %s326_s15 = scalar_lea.vmem %s1289_s12, %s325_s25 [#allocation4]  ;;  %s927_s17 = sshll.u32 %s331_s28, 5 }
  0x6d   : > { %v327_v10 = vld [vmem:[%s326_s15] ss:$8 sm:$0xf]  ;;  %s343_s27 = sshra.s32 %s1357_s6, 3  ;;  %s337_s10 = sadd.s32 %s927_s17, %s334_s1 }
  0x6e   : > { %841 = vst.msk [vmem:[%s1317_s26 + $0x20] ss:$8 sm:$0xf] %vm1312_vm0, %v327_v10  ;;  %s346_s11 = sand.u32 7, %s1357_s6  ;;  %s338_s9 = scalar_lea.vmem %s1289_s12, %s337_s10 [#allocation4] }
  0x6f   : > { %s928_s16 = sshll.u32 %s343_s27, 5  ;;  %v339_v11 = vld [vmem:[%s338_s9] ss:$8 sm:$0xf]  ;;  %s179_s18 = sld [smem:[#allocation3 + %s178_s0]] }
  0x70   : > { %s349_s7 = sadd.s32 %s928_s16, %s346_s11  ;;  %844 = vst.msk [vmem:[%s1317_s26 + $0x21] ss:$8 sm:$0xf] %vm1312_vm0, %v339_v11  ;;  %s180_s30 = sadd.s32 12, %s1297_s13 }
  0x71   : > { %s350_s29 = scalar_lea.vmem %s1289_s12, %s349_s7 [#allocation4]  ;;  %s181_s14 = sld [smem:[#allocation3 + %s180_s30]] }
  0x72   : > { %v351_v12 = vld [vmem:[%s350_s29] ss:$8 sm:$0xf]  ;;  %s182_s25 = sadd.s32 13, %s1297_s13  ;;  %s184_s28 = sadd.s32 14, %s1297_s13 }
  0x73   : > { %847 = vst.msk [vmem:[%s1317_s26 + $0x22] ss:$8 sm:$0xf] %vm1312_vm0, %v351_v12  ;;  %s183_s6 = sld [smem:[#allocation3 + %s182_s25]]  ;;  %s186_s1 = sadd.s32 15, %s1297_s13 }
  0x74   : > { %s1388_s15 = sld [smem:[#allocation3 + %s184_s28]]  ;;  %s188_s0 = sadd.s32 16, %s1297_s13 }
  0x75   : > { %s1391_s17 = sld [smem:[#allocation3 + %s186_s1]]  ;;  %s355_s27 = sshra.s32 %s179_s18, 3 }
  0x76   : > { %s358_s10 = sand.u32 7, %s179_s18  ;;  %s929_s11 = sshll.u32 %s355_s27, 5 }
  0x77   : > { %s1394_s9 = sld [smem:[#allocation3 + %s188_s0]]  ;;  %s361_s16 = sadd.s32 %s929_s11, %s358_s10 }
  0x78   : > { %s367_s7 = sshra.s32 %s181_s14, 3  ;;  %s362_s29 = scalar_lea.vmem %s1289_s12, %s361_s16 [#allocation4] }
  0x79   : > { %s370_s30 = sand.u32 7, %s181_s14  ;;  %v363_v13 = vld [vmem:[%s362_s29] ss:$8 sm:$0xf]  ;;  %s930_s25 = sshll.u32 %s367_s7, 5 }
  0x7a   : > { %s379_s28 = sshra.s32 %s183_s6, 3  ;;  %850 = vst.msk [vmem:[%s1317_s26 + $0x23] ss:$8 sm:$0xf] %vm1312_vm0, %v363_v13  ;;  %s373_s18 = sadd.s32 %s930_s25, %s370_s30 }
  0x7b   : > { %s382_s1 = sand.u32 7, %s183_s6  ;;  %s374_s0 = scalar_lea.vmem %s1289_s12, %s373_s18 [#allocation4] }
  0x7c   : > { %s931_s27 = sshll.u32 %s379_s28, 5  ;;  %v375_v14 = vld [vmem:[%s374_s0] ss:$8 sm:$0xf]  ;;  %s391_s11 = sshra.s32 %s1388_s15, 3 }
  0x7d   : > { %s385_s10 = sadd.s32 %s931_s27, %s382_s1  ;;  %853 = vst.msk [vmem:[%s1317_s26 + $0x24] ss:$8 sm:$0xf] %vm1312_vm0, %v375_v14  ;;  %s394_s16 = sand.u32 7, %s1388_s15 }
  0x7e   : > { %s386_s14 = scalar_lea.vmem %s1289_s12, %s385_s10 [#allocation4]  ;;  %s932_s7 = sshll.u32 %s391_s11, 5 }
  0x7f   : > { %v387_v15 = vld [vmem:[%s386_s14] ss:$8 sm:$0xf]  ;;  %s403_s29 = sshra.s32 %s1391_s17, 3  ;;  %s397_s6 = sadd.s32 %s932_s7, %s394_s16 }
  0x80   : > { %856 = vst.msk [vmem:[%s1317_s26 + $0x25] ss:$8 sm:$0xf] %vm1312_vm0, %v387_v15  ;;  %s406_s30 = sand.u32 7, %s1391_s17  ;;  %s398_s25 = scalar_lea.vmem %s1289_s12, %s397_s6 [#allocation4] }
  0x81   : > { %s933_s28 = sshll.u32 %s403_s29, 5  ;;  %v399_v16 = vld [vmem:[%s398_s25] ss:$8 sm:$0xf]  ;;  %s415_s1 = sshra.s32 %s1394_s9, 3 }
  0x82   : > { %s409_s18 = sadd.s32 %s933_s28, %s406_s30  ;;  %859 = vst.msk [vmem:[%s1317_s26 + $0x26] ss:$8 sm:$0xf] %vm1312_vm0, %v399_v16  ;;  %s418_s0 = sand.u32 7, %s1394_s9 }
  0x83   : > { %s410_s15 = scalar_lea.vmem %s1289_s12, %s409_s18 [#allocation4]  ;;  %s934_s27 = sshll.u32 %s415_s1, 5 }
  0x84   : > { %v411_v17 = vld [vmem:[%s410_s15] ss:$8 sm:$0xf]  ;;  %s190_s10 = sadd.s32 17, %s1297_s13  ;;  %s421_s17 = sadd.s32 %s934_s27, %s418_s0 }
  0x85   : > { %862 = vst.msk [vmem:[%s1317_s26 + $0x27] ss:$8 sm:$0xf] %vm1312_vm0, %v411_v17  ;;  %s191_s11 = sld [smem:[#allocation3 + %s190_s10]]  ;;  %s422_s14 = scalar_lea.vmem %s1289_s12, %s421_s17 [#allocation4] }
  0x86   : > { %s192_s16 = sadd.s32 18, %s1297_s13  ;;  %v423_v18 = vld [vmem:[%s422_s14] ss:$8 sm:$0xf]  ;;  %s194_s29 = sadd.s32 19, %s1297_s13 }
  0x87   : > { %s193_s7 = sld [smem:[#allocation3 + %s192_s16]]  ;;  %865 = vst.msk [vmem:[%s1317_s26 + $0x40] ss:$8 sm:$0xf] %vm1312_vm0, %v423_v18  ;;  %s196_s6 = sadd.s32 20, %s1297_s13 }
  0x88   : > { %s195_s9 = sld [smem:[#allocation3 + %s194_s29]]  ;;  %s198_s25 = sadd.s32 21, %s1297_s13 }
  0x89   : > { %s1430_s30 = sld [smem:[#allocation3 + %s196_s6]]  ;;  %s200_s18 = sadd.s32 22, %s1297_s13 }
  0x8a   : > { %s1433_s28 = sld [smem:[#allocation3 + %s198_s25]] }
  0x8b   : > { %s427_s1 = sshra.s32 %s191_s11, 3  ;;  %s430_s15 = sand.u32 7, %s191_s11 }
  0x8c   : > { %s935_s0 = sshll.u32 %s427_s1, 5  ;;  %s1436_s27 = sld [smem:[#allocation3 + %s200_s18]] }
  0x8d   : > { %s433_s10 = sadd.s32 %s935_s0, %s430_s15  ;;  %s439_s17 = sshra.s32 %s193_s7, 3 }
  0x8e   : > { %s434_s14 = scalar_lea.vmem %s1289_s12, %s433_s10 [#allocation4]  ;;  %s442_s16 = sand.u32 7, %s193_s7 }
  0x8f   : > { %v435_v19 = vld [vmem:[%s434_s14] ss:$8 sm:$0xf]  ;;  %s936_s29 = sshll.u32 %s439_s17, 5  ;;  %s451_s6 = sshra.s32 %s195_s9, 3 }
  0x90   : > { %868 = vst.msk [vmem:[%s1317_s26 + $0x41] ss:$8 sm:$0xf] %vm1312_vm0, %v435_v19  ;;  %s445_s11 = sadd.s32 %s936_s29, %s442_s16  ;;  %s454_s25 = sand.u32 7, %s195_s9 }
  0x91   : > { %s446_s18 = scalar_lea.vmem %s1289_s12, %s445_s11 [#allocation4]  ;;  %s937_s1 = sshll.u32 %s451_s6, 5 }
  0x92   : > { %v447_v20 = vld [vmem:[%s446_s18] ss:$8 sm:$0xf]  ;;  %s457_s15 = sadd.s32 %s937_s1, %s454_s25  ;;  %s463_s0 = sshra.s32 %s1430_s30, 3 }
  0x93   : > { %871 = vst.msk [vmem:[%s1317_s26 + $0x42] ss:$8 sm:$0xf] %vm1312_vm0, %v447_v20  ;;  %s458_s7 = scalar_lea.vmem %s1289_s12, %s457_s15 [#allocation4]  ;;  %s466_s10 = sand.u32 7, %s1430_s30 }
  0x94   : > { %v459_v21 = vld [vmem:[%s458_s7] ss:$8 sm:$0xf]  ;;  %s938_s17 = sshll.u32 %s463_s0, 5  ;;  %s475_s14 = sshra.s32 %s1433_s28, 3 }
  0x95   : > { %874 = vst.msk [vmem:[%s1317_s26 + $0x43] ss:$8 sm:$0xf] %vm1312_vm0, %v459_v21  ;;  %s469_s9 = sadd.s32 %s938_s17, %s466_s10  ;;  %s478_s16 = sand.u32 7, %s1433_s28 }
  0x96   : > { %s470_s29 = scalar_lea.vmem %s1289_s12, %s469_s9 [#allocation4]  ;;  %s939_s6 = sshll.u32 %s475_s14, 5 }
  0x97   : > { %v471_v22 = vld [vmem:[%s470_s29] ss:$8 sm:$0xf]  ;;  %s481_s11 = sadd.s32 %s939_s6, %s478_s16  ;;  %s487_s25 = sshra.s32 %s1436_s27, 3 }
  0x98   : > { %877 = vst.msk [vmem:[%s1317_s26 + $0x44] ss:$8 sm:$0xf] %vm1312_vm0, %v471_v22  ;;  %s482_s30 = scalar_lea.vmem %s1289_s12, %s481_s11 [#allocation4]  ;;  %s490_s18 = sand.u32 7, %s1436_s27 }
  0x99   : > { %v483_v23 = vld [vmem:[%s482_s30] ss:$8 sm:$0xf]  ;;  %s940_s1 = sshll.u32 %s487_s25, 5  ;;  %s202_s15 = sadd.s32 23, %s1297_s13 }
  0x9a   : > { %880 = vst.msk [vmem:[%s1317_s26 + $0x45] ss:$8 sm:$0xf] %vm1312_vm0, %v483_v23  ;;  %s493_s28 = sadd.s32 %s940_s1, %s490_s18  ;;  %s203_s0 = sld [smem:[#allocation3 + %s202_s15]] }
  0x9b   : > { %s494_s7 = scalar_lea.vmem %s1289_s12, %s493_s28 [#allocation4]  ;;  %s204_s10 = sadd.s32 24, %s1297_s13 }
  0x9c   : > { %v495_v24 = vld [vmem:[%s494_s7] ss:$8 sm:$0xf]  ;;  %s205_s17 = sld [smem:[#allocation3 + %s204_s10]]  ;;  %s206_s14 = sadd.s32 25, %s1297_s13 }
  0x9d   : > { %883 = vst.msk [vmem:[%s1317_s26 + $0x46] ss:$8 sm:$0xf] %vm1312_vm0, %v495_v24  ;;  %s207_s27 = sld [smem:[#allocation3 + %s206_s14]]  ;;  %s208_s9 = sadd.s32 26, %s1297_s13 }
  0x9e   : > { %s1472_s16 = sld [smem:[#allocation3 + %s208_s9]]  ;;  %s210_s29 = sadd.s32 27, %s1297_s13 }
  0x9f   : > { %s1475_s6 = sld [smem:[#allocation3 + %s210_s29]]  ;;  %s212_s11 = sadd.s32 28, %s1297_s13 }
  0xa0   : > { %s499_s25 = sshra.s32 %s203_s0, 3  ;;  %s502_s30 = sand.u32 7, %s203_s0 }
  0xa1   : > { %s941_s18 = sshll.u32 %s499_s25, 5  ;;  %s1478_s1 = sld [smem:[#allocation3 + %s212_s11]] }
  0xa2   : > { %s505_s15 = sadd.s32 %s941_s18, %s502_s30  ;;  %s511_s28 = sshra.s32 %s205_s17, 3 }
  0xa3   : > { %s506_s7 = scalar_lea.vmem %s1289_s12, %s505_s15 [#allocation4]  ;;  %s514_s10 = sand.u32 7, %s205_s17 }
  0xa4   : > { %v507_v25 = vld [vmem:[%s506_s7] ss:$8 sm:$0xf]  ;;  %s942_s14 = sshll.u32 %s511_s28, 5  ;;  %s523_s9 = sshra.s32 %s207_s27, 3 }
  0xa5   : > { %886 = vst.msk [vmem:[%s1317_s26 + $0x47] ss:$8 sm:$0xf] %vm1312_vm0, %v507_v25  ;;  %s517_s0 = sadd.s32 %s942_s14, %s514_s10  ;;  %s526_s29 = sand.u32 7, %s207_s27 }
  0xa6   : > { %s518_s11 = scalar_lea.vmem %s1289_s12, %s517_s0 [#allocation4]  ;;  %s943_s25 = sshll.u32 %s523_s9, 5 }
  0xa7   : > { %v519_v26 = vld [vmem:[%s518_s11] ss:$8 sm:$0xf]  ;;  %s529_s30 = sadd.s32 %s943_s25, %s526_s29  ;;  %s535_s18 = sshra.s32 %s1472_s16, 3 }
  0xa8   : > { %889 = vst.msk [vmem:[%s1317_s26 + $0x60] ss:$8 sm:$0xf] %vm1312_vm0, %v519_v26  ;;  %s530_s17 = scalar_lea.vmem %s1289_s12, %s529_s30 [#allocation4]  ;;  %s538_s15 = sand.u32 7, %s1472_s16 }
  0xa9   : > { %v531_v27 = vld [vmem:[%s530_s17] ss:$8 sm:$0xf]  ;;  %s944_s28 = sshll.u32 %s535_s18, 5  ;;  %s547_s7 = sshra.s32 %s1475_s6, 3 }
  0xaa   : > { %892 = vst.msk [vmem:[%s1317_s26 + $0x61] ss:$8 sm:$0xf] %vm1312_vm0, %v531_v27  ;;  %s541_s27 = sadd.s32 %s944_s28, %s538_s15  ;;  %s550_s10 = sand.u32 7, %s1475_s6 }
  0xab   : > { %s542_s14 = scalar_lea.vmem %s1289_s12, %s541_s27 [#allocation4]  ;;  %s945_s9 = sshll.u32 %s547_s7, 5 }
  0xac   : > { %v543_v28 = vld [vmem:[%s542_s14] ss:$8 sm:$0xf]  ;;  %s553_s0 = sadd.s32 %s945_s9, %s550_s10  ;;  %s559_s29 = sshra.s32 %s1478_s1, 3 }
  0xad   : > { %895 = vst.msk [vmem:[%s1317_s26 + $0x62] ss:$8 sm:$0xf] %vm1312_vm0, %v543_v28  ;;  %s554_s16 = scalar_lea.vmem %s1289_s12, %s553_s0 [#allocation4]  ;;  %s562_s11 = sand.u32 7, %s1478_s1 }
  0xae   : > { %v555_v29 = vld [vmem:[%s554_s16] ss:$8 sm:$0xf]  ;;  %s946_s25 = sshll.u32 %s559_s29, 5  ;;  %s214_s30 = sadd.s32 29, %s1297_s13 }
  0xaf   : > { %898 = vst.msk [vmem:[%s1317_s26 + $0x63] ss:$8 sm:$0xf] %vm1312_vm0, %v555_v29  ;;  %s565_s6 = sadd.s32 %s946_s25, %s562_s11  ;;  %s215_s18 = sld [smem:[#allocation3 + %s214_s30]] }
  0xb0   : > { %s566_s17 = scalar_lea.vmem %s1289_s12, %s565_s6 [#allocation4]  ;;  %s216_s15 = sadd.s32 30, %s1297_s13 }
  0xb1   : > { %v567_v30 = vld [vmem:[%s566_s17] ss:$8 sm:$0xf]  ;;  %s217_s28 = sld [smem:[#allocation3 + %s216_s15]]  ;;  %s218_s7 = sadd.s32 31, %s1297_s13 }
  0xb2   : > { %901 = vst.msk [vmem:[%s1317_s26 + $0x64] ss:$8 sm:$0xf] %vm1312_vm0, %v567_v30  ;;  %s219_s27 = sld [smem:[#allocation3 + %s218_s7]]  ;;  %s950_s1 = sshll.u32 %s1132_s22, 11 }
  0xb3   : > { %s624_s10 = sshll.u32 %s1317_s26, 4  ;;  %s1518_s0 = scalar_lea.hbm %s1583_s2, %s950_s1  ;;  %s1520_s10 = int_to_ptr.vmem [resolvable:$true] %s624_s10 }
  0xb4   : > { %s608_s9 = scalar_lea.sflag [#allocation6], %s1285_s8 }
  0xb5   : > { %s571_s29 = sshra.s32 %s215_s18, 3  ;;  %s574_s16 = sand.u32 7, %s215_s18 }
  0xb6   : > { %s947_s11 = sshll.u32 %s571_s29, 5  ;;  %s1056_s29 = scalar_lea.vmem %s1520_s10, 2048 }
  0xb7   : > { %s577_s13 = sadd.s32 %s947_s11, %s574_s16  ;;  %s583_s25 = sshra.s32 %s217_s28, 3 }
  0xb8   : > { %s578_s30 = scalar_lea.vmem %s1289_s12, %s577_s13 [#allocation4]  ;;  %s586_s22 = sand.u32 7, %s217_s28 }
  0xb9   : > { %v579_v31 = vld [vmem:[%s578_s30] ss:$8 sm:$0xf]  ;;  %s948_s6 = sshll.u32 %s583_s25, 5  ;;  %s595_s17 = sshra.s32 %s219_s27, 3 }
  0xba   : > { %904 = vst.msk [vmem:[%s1317_s26 + $0x65] ss:$8 sm:$0xf] %vm1312_vm0, %v579_v31  ;;  %s589_s18 = sadd.s32 %s948_s6, %s586_s22  ;;  %s598_s15 = sand.u32 7, %s219_s27 }
  0xbb   : > { %s590_s7 = scalar_lea.vmem %s1289_s12, %s589_s18 [#allocation4]  ;;  %s949_s1 = sshll.u32 %s595_s17, 5 }
  0xbc   : > { %v591_v32 = vld [vmem:[%s590_s7] ss:$8 sm:$0xf]  ;;  %s601_s14 = sadd.s32 %s949_s1, %s598_s15  ;;  %p1057_p11 = scmp.ne.s32.totalorder %s1520_s10, %s1056_s29 }
  0xbd   : > { %907 = vst.msk [vmem:[%s1317_s26 + $0x66] ss:$8 sm:$0xf] %vm1312_vm0, %v591_v32  ;;  %s602_s28 = scalar_lea.vmem %s1289_s12, %s601_s14 [#allocation4]  ;;  %s1144_s27 = smov [#allocation7]  }
  0xbe   : > { %v603_v33 = vld [vmem:[%s602_s28] ss:$8 sm:$0xf]  ;;  %p1058_p0 = pnand %p1057_p11, %p1599_p12  ;;  %s1060_s16 = sshll.u32 %s1144_s27, 4  ;;  %s1061_s16 = int_to_ptr.vmem [resolvable:$false] %s1060_s16 }
  0xbf   : > { %910 = vst.msk [vmem:[%s1317_s26 + $0x67] ss:$8 sm:$0xf] %vm1312_vm0, %v603_v33  ;;  %s1062_s11 = scalar_lea.vmem %s1061_s16, 4096  ;;  %p1063_p10 = scmp.lt.s32.totalorder %s1520_s10, %s1061_s16 }
  0xc0   : > { %p1059_p3 = pneg %p1058_p0  ;;  %p1064_p2 = scmp.lt.s32.totalorder %s1062_s11, %s1056_s29 }
  0xc2   : > { %p1065_p6 = por %p1064_p2, %p1063_p10 }
  0xc4   : > { %p1066_p9 = pnand %p1065_p6, %p1059_p3 }
  0xc6   : > { %1069 = shalt.err (!%p1066_p9)
}
  0xc7   : > { %s1070_s26 = scalar_lea.hbm %s1518_s0, 2048  ;;  %s1074_s25 = scalar_lea.hbm %s1583_s2, 4096 }
  0xc8   : > { %p1071_p7 = scmp.ne.s32.totalorder %s1518_s0, %s1070_s26  ;;  %p1075_p4 = scmp.lt.u32.totalorder %s1518_s0, %s1583_s2 }
  0xc9   : > { %p1076_p5 = scmp.lt.u32.totalorder %s1074_s25, %s1070_s26  ;;  %p1078_p11 = scmp.lt.u32.totalorder %s1070_s26, %s1518_s0 }
  0xca   : > { %p1072_p13 = pnand %p1071_p7, %p1599_p12 }
  0xcb   : > { %p1077_p8 = por %p1076_p5, %p1075_p4 }
  0xcc   : > { %p1073_p1 = pneg %p1072_p13 }
  0xcd   : > { %p1079_p0 = por %p1078_p11, %p1077_p8 }
  0xcf   : > { %p1080_p3 = pnand %p1079_p0, %p1073_p1 }
  0xd1   : > { %1083 = shalt.err (!%p1080_p3)
}
  0xd2   : > { %s1145_s6 = smov 512   ;;  %s1146_s17 = smov 32  }
  0xd3   : > { %953 = dma.vmem_to_hbm [thread:$0]  (%p1599_p12), %s1520_s10, 2048, %s1518_s0, %s608_s9, %s1145_s6, %s1145_s6, %s1146_s17  }
  0xd4 PF: > { %s639_s18 = sand.u32 1, %s1120_s19   ;;  %p1600_p10 = scmp.ne.s32.totalorder %s1591_s5, 0 }
  0xd5   : > { %p1601_p2 = scmp.ge.s32.totalorder %s1140_s24, 2  ;;  %s640_s15 = scalar_lea.sflag [#allocation6], %s639_s18 }
  0xd7   : > { %p960_p6 = pnand %p1601_p2, %p1600_p10 }
  0xd9   : > { %1115 = dma.done.wait (!%p960_p6), %s640_s15, 2048  }
  0xda   : > { %1117 = vsyncadd (!%p960_p6), %s640_s15, 4294965248  ;;  %s22_s24 = sadd.s32 1, %s1140_s24   ;;  %s1602_s3 = sld [smem:[#allocation11_spill]] }
  0xdb   : > { %p19_p9 = scmp.ge.s32.totalorder %s22_s24, 4   ;;  %s1603_s19 = smov %s1124_s20 }
  0xdc   : > { %s1604_s20 = smov %s1128_s21  ;;  %s1605_s21 = smov %s1230_s4 }
  0xdd   : > { %s1606_s22 = smov %s1136_s23  ;;  %21 = sbr.rel (!%p19_p9) target bundleno = 18 (0x12), region = 132 }
  0xe0   : > { %s1607_s23 = smov %s1602_s3 }
  0xe4   :  { %645 = vsyncpa [#allocation5], 1 }
  0xe5   :  { %647 = vsyncpa [#allocation5 + $0x1], 1 }
  0xe6   :  { %648 = vsyncpa [#allocation6], 1 }
  0xe7   :  { %650 = vsyncpa [#allocation6 + $0x1], 1 }

</bundles_post_ra>
